<compile_context>
chip_gen: v6e
topology: v6e:2x2x1
jax: 0.10.0
libtpu: 0.0.40
codegen_flags: <defaults>
</compile_context>

<pallas_src>
import functools

import jax
import jax.numpy as jnp
from jax.experimental import pallas as pl
from jax.experimental.pallas import tpu as pltpu


# ---------------------------------------------------------------------------
# Fused kernel: conv1(3x3,d=5)+BN+ReLU -> conv2(3x3,d=1)+BN+ReLU -> conv3(1x1)
# ---------------------------------------------------------------------------
def _block_type_c_kernel(x_ref, w1_ref, b1_ref, w2_ref, b2_ref, w3_ref, b3_ref,
                         o_ref, xpad_ref, *, H, W, M):
    # x_ref  : (1, Cin, H*W)   one batch element, NCHW flattened (lane dim = H*W)
    # w1_ref : (Cin, 9*Cin)    conv1 im2col weights, BN1 scale pre-folded
    # b1_ref : (Cin, 1)        folded conv1+BN1 bias
    # w2_ref : (Cin, 9*Cin)    conv2 im2col weights, BN2 scale pre-folded
    # b2_ref : (Cin, 1)
    # w3_ref : (Cout, Cin)     1x1 conv weights
    # b3_ref : (Cout, 1)       1x1 conv bias
    # o_ref  : (1, Cout, H*W)
    # xpad_ref: (Cin, M + H*W + M) flat zero-halo scratch shared by both convs
    Cin = x_ref.shape[1]
    HW = H * W

    # Zero the halo margins every step (interior is fully overwritten below).
    # Margin offsets are multiples of 128 -> aligned, unmasked vector stores.
    zeros_m = jnp.zeros((Cin, M), jnp.float32)
    xpad_ref[:, :M] = zeros_m
    xpad_ref[:, M + HW:] = zeros_m

    # Column-within-row index of every flattened pixel (computed once).
    col = jax.lax.broadcasted_iota(jnp.int32, (1, HW), 1) % W

    def conv3x3(w_ref, b_ref, dil):
        # 'same' 3x3 conv with padding == dilation == dil as one im2col matmul.
        # Each tap = static lane-shift of the flat halo buffer + column mask
        # (the row halo is handled by the zero margins).
        mask = {+dil: col < (W - dil), -dil: col >= dil}   # hoisted, 2 masks
        taps = []
        for ky in range(3):
            for kx in range(3):
                dx = (kx - 1) * dil
                s = (ky - 1) * dil * W + dx
                slab = xpad_ref[:, M + s:M + s + HW]       # (Cin, HW)
                taps.append(slab if dx == 0 else jnp.where(mask[dx], slab, 0.0))
        patches = jnp.concatenate(taps, axis=0)            # (9*Cin, HW)
        y = jnp.dot(w_ref[...], patches, preferred_element_type=jnp.float32)
        return jnp.maximum(y + b_ref[...], 0.0)            # fused BN + ReLU

    # ---- conv1: 3x3, dilation=5, padding=5
    xpad_ref[:, M:M + HW] = x_ref[0].astype(jnp.float32)
    y1 = conv3x3(w1_ref, b1_ref, 5)                        # (Cin, HW)

    # ---- conv2: 3x3, dilation=1, padding=1 (y1 never leaves VMEM)
    xpad_ref[:, M:M + HW] = y1
    y2 = conv3x3(w2_ref, b2_ref, 1)                        # (Cin, HW)

    # ---- conv3: 1x1 + bias, lane-dense (Cout, H*W) store
    y3 = jnp.dot(w3_ref[...], y2,
                 preferred_element_type=jnp.float32) + b3_ref[...]
    o_ref[0] = y3.astype(o_ref.dtype)


# ---------------------------------------------------------------------------
# Wrapper: NCHW in / NCHW out, no transposes (only free contiguous reshapes)
# ---------------------------------------------------------------------------
def block_type_c_forward(x_nchw, p):
    N, Cin, H, W = x_nchw.shape
    out_c = p["w3k"].shape[0]
    HW = H * W
    assert HW % 128 == 0, "H*W must be a multiple of 128 for lane-dense tiles"
    # Halo width >= max flat shift (5*W + 5), rounded up to a lane tile.
    M = ((5 * W + 5 + 127) // 128) * 128

    x_flat = x_nchw.reshape(N, Cin, HW)   # free: NCHW is (C, H*W)-contiguous

    kernel = functools.partial(_block_type_c_kernel, H=H, W=W, M=M)
    out = pl.pallas_call(
        kernel,
        out_shape=jax.ShapeDtypeStruct((N, out_c, HW), x_nchw.dtype),
        grid_spec=pltpu.PrefetchScalarGridSpec(
            num_scalar_prefetch=0,
            grid=(N,),
            in_specs=[
                pl.BlockSpec((1, Cin, HW), lambda n: (n, 0, 0)),
                pl.BlockSpec((Cin, 9 * Cin), lambda n: (0, 0)),
                pl.BlockSpec((Cin, 1), lambda n: (0, 0)),
                pl.BlockSpec((Cin, 9 * Cin), lambda n: (0, 0)),
                pl.BlockSpec((Cin, 1), lambda n: (0, 0)),
                pl.BlockSpec((out_c, Cin), lambda n: (0, 0)),
                pl.BlockSpec((out_c, 1), lambda n: (0, 0)),
            ],
            out_specs=pl.BlockSpec((1, out_c, HW), lambda n: (n, 0, 0)),
            scratch_shapes=[
                pltpu.VMEM((Cin, HW + 2 * M), jnp.float32),   # shared halo buf
            ],
        ),
        compiler_params=pltpu.CompilerParams(
            dimension_semantics=("parallel",)),
    )(x_flat, p["w1k"], p["b1k"], p["w2k"], p["b2k"], p["w3k"], p["b3k"])
    return out.reshape(N, out_c, H, W)    # free reshape: already NCHW-contiguous


# ---------------------------------------------------------------------------
# Parameter construction (deterministic, synthetic) + BN folding
# ---------------------------------------------------------------------------
def make_params(key, in_c, out_c):
    ks = jax.random.split(key, 12)
    eps = 1e-5

    def bn(k0, k1, c):
        gamma = 1.0 + 0.1 * jax.random.normal(k0, (c,), jnp.float32)
        beta = 0.1 * jax.random.normal(k1, (c,), jnp.float32)
        mean = 0.05 * jax.random.normal(k0, (c,), jnp.float32)
        var = 0.5 + jax.random.uniform(k1, (c,), jnp.float32)
        return gamma, beta, mean, var

    # conv1 (3x3, dil=5) + BN1
    w1 = 0.1 * jax.random.normal(ks[0], (3, 3, in_c, in_c), jnp.float32)  # HWIO
    b1 = 0.05 * jax.random.normal(ks[1], (in_c,), jnp.float32)
    g1, be1, m1, v1 = bn(ks[2], ks[3], in_c)
    s1 = g1 / jnp.sqrt(v1 + eps)
    bias1 = be1 + (b1 - m1) * s1

    # conv2 (3x3, dil=1) + BN2
    w2 = 0.1 * jax.random.normal(ks[4], (3, 3, in_c, in_c), jnp.float32)  # HWIO
    b2 = 0.05 * jax.random.normal(ks[5], (in_c,), jnp.float32)
    g2, be2, m2, v2 = bn(ks[6], ks[7], in_c)
    s2 = g2 / jnp.sqrt(v2 + eps)
    bias2 = be2 + (b2 - m2) * s2

    # conv3 (1x1)
    w3 = 0.1 * jax.random.normal(ks[8], (in_c, out_c), jnp.float32)       # (Cin, Cout)
    b3 = 0.05 * jax.random.normal(ks[9], (out_c,), jnp.float32)

    def hwio_to_im2col(w_hwio):
        # (3,3,Cin,Cout) -> (Cout, 9*Cin); column order (ky, kx, cin) matches
        # the order in which the kernel stacks the 9 shifted taps.
        cout = w_hwio.shape[-1]
        return jnp.transpose(w_hwio, (3, 0, 1, 2)).reshape(cout, -1)

    return dict(
        # reference-layout params
        w1=w1, s1=s1, bias1=bias1, w2=w2, s2=s2, bias2=bias2, w3=w3, b3=b3,
        # kernel-layout params (BN scale folded into the weights)
        w1k=(hwio_to_im2col(w1) * s1[:, None]).astype(jnp.float32),
        b1k=bias1.reshape(in_c, 1).astype(jnp.float32),
        w2k=(hwio_to_im2col(w2) * s2[:, None]).astype(jnp.float32),
        b2k=bias2.reshape(in_c, 1).astype(jnp.float32),
        w3k=jnp.transpose(w3).astype(jnp.float32),        # (Cout, Cin)
        b3k=b3.reshape(out_c, 1).astype(jnp.float32),
    )


# ---------------------------------------------------------------------------
# Pure-JAX reference (for correctness check)
# ---------------------------------------------------------------------------
def block_type_c_ref(x_nchw, p):
    x = jnp.transpose(x_nchw, (0, 2, 3, 1))
    dn = ("NHWC", "HWIO", "NHWC")

    def conv(x, w, dil, pad):
        return jax.lax.conv_general_dilated(
            x, w, window_strides=(1, 1),
            padding=[(pad, pad), (pad, pad)],
            rhs_dilation=(dil, dil), dimension_numbers=dn)

    x = jnp.maximum(conv(x, p["w1"], 5, 5) * p["s1"] + p["bias1"], 0.0)
    x = jnp.maximum(conv(x, p["w2"], 1, 1) * p["s2"] + p["bias2"], 0.0)
    x = conv(x, p["w3"].reshape(1, 1, *p["w3"].shape), 1, 0) + p["b3"]
    return jnp.transpose(x, (0, 3, 1, 2))


if __name__ == "__main__":
    key = jax.random.PRNGKey(0)
    k_x, k_p = jax.random.split(key)

    N, in_c, out_c, H, W = 2, 4, 8, 16, 16
    x = jax.random.normal(k_x, (N, in_c, H, W), jnp.float32)  # NCHW like PyTorch
    params = make_params(k_p, in_c, out_c)

    out = jax.block_until_ready(block_type_c_forward(x, params))
    ref = jax.block_until_ready(block_type_c_ref(x, params))

    assert out.shape == (N, out_c, H, W), out.shape
    assert jnp.allclose(out, ref, rtol=1e-4, atol=1e-4), \
        float(jnp.max(jnp.abs(out - ref)))

    print("KERNEL_OK")
</pallas_src>

<mosaic_0001>
module attributes {stable_mosaic.version = 11 : i64} {
  func.func @_block_type_c_kernel(%arg0: i32, %arg1: memref<1x4x256xf32, #tpu.memory_space<vmem>>, %arg2: memref<4x36xf32, #tpu.memory_space<vmem>>, %arg3: memref<4x1xf32, #tpu.memory_space<vmem>>, %arg4: memref<4x36xf32, #tpu.memory_space<vmem>>, %arg5: memref<4x1xf32, #tpu.memory_space<vmem>>, %arg6: memref<8x4xf32, #tpu.memory_space<vmem>>, %arg7: memref<8x1xf32, #tpu.memory_space<vmem>>, %arg8: memref<1x8x256xf32, #tpu.memory_space<vmem>>, %arg9: memref<4x512xf32, #tpu.memory_space<vmem>>) attributes {dimension_semantics = [#tpu.dimension_semantics<parallel>], iteration_bounds = array<i64: 2>, scalar_prefetch = 0 : i64, scratch_operands = 1 : i64, tpu.core_type = #tpu.core_type<tc>, window_params = [{transform_indices = @transform_0, window_bounds = array<i64: 1, 4, 256>}, {pipeline_mode = #tpu.pipeline_mode<synchronous>, transform_indices = @transform_1, window_bounds = array<i64: 4, 36>}, {pipeline_mode = #tpu.pipeline_mode<synchronous>, transform_indices = @transform_2, window_bounds = array<i64: 4, 1>}, {pipeline_mode = #tpu.pipeline_mode<synchronous>, transform_indices = @transform_3, window_bounds = array<i64: 4, 36>}, {pipeline_mode = #tpu.pipeline_mode<synchronous>, transform_indices = @transform_4, window_bounds = array<i64: 4, 1>}, {pipeline_mode = #tpu.pipeline_mode<synchronous>, transform_indices = @transform_5, window_bounds = array<i64: 8, 4>}, {pipeline_mode = #tpu.pipeline_mode<synchronous>, transform_indices = @transform_6, window_bounds = array<i64: 8, 1>}, {transform_indices = @transform_7, window_bounds = array<i64: 1, 8, 256>}]} {
    %cst = arith.constant 0.000000e+00 : f32
    %0 = vector.broadcast %cst : f32 to vector<4x128xf32>
    %c0 = arith.constant 0 : index
    %c0_0 = arith.constant 0 : index
    %1 = vector.load %arg9[%c0, %c0_0] : memref<4x512xf32, #tpu.memory_space<vmem>>, vector<4x128xf32>
    tpu.vector_store %arg9[%c0, %c0_0], %0 {strides = array<i32>} : memref<4x512xf32, #tpu.memory_space<vmem>>, vector<4x128xf32>,
    %c0_1 = arith.constant 0 : index
    %c384 = arith.constant 384 : index
    %2 = vector.load %arg9[%c0_1, %c384] : memref<4x512xf32, #tpu.memory_space<vmem>>, vector<4x128xf32>
    tpu.vector_store %arg9[%c0_1, %c384], %0 {strides = array<i32>} : memref<4x512xf32, #tpu.memory_space<vmem>>, vector<4x128xf32>,
    %3 = tpu.iota {dimensions = array<i32: 1>} : vector<1x256xi32>
    %c16_i32 = arith.constant 16 : i32
    %c0_i32 = arith.constant 0 : i32
    %4 = arith.cmpi eq, %c16_i32, %c0_i32 : i32
    %c1_i32 = arith.constant 1 : i32
    %5 = arith.select %4, %c1_i32, %c16_i32 : i32
    %6 = vector.broadcast %5 : i32 to vector<1x256xi32>
    %7 = arith.remsi %3, %6 : vector<1x256xi32>
    %c0_i32_2 = arith.constant 0 : i32
    %8 = vector.broadcast %c0_i32_2 : i32 to vector<1x256xi32>
    %9 = arith.cmpi ne, %7, %8 : vector<1x256xi32>
    %c0_i32_3 = arith.constant 0 : i32
    %10 = vector.broadcast %c0_i32_3 : i32 to vector<1x256xi32>
    %11 = arith.cmpi slt, %7, %10 : vector<1x256xi32>
    %c0_i32_4 = arith.constant 0 : i32
    %12 = arith.cmpi slt, %5, %c0_i32_4 : i32
    %13 = vector.broadcast %12 : i1 to vector<1x256xi1>
    %14 = vector.broadcast %13 : vector<1x256xi1> to vector<1x256xi1>
    %15 = arith.xori %11, %14 : vector<1x256xi1>
    %16 = arith.andi %15, %9 : vector<1x256xi1>
    %17 = vector.broadcast %5 : i32 to vector<1x256xi32>
    %18 = arith.addi %7, %17 : vector<1x256xi32>
    %19 = arith.select %16, %18, %7 : vector<1x256xi1>, vector<1x256xi32>
    %c0_5 = arith.constant 0 : index
    %c0_6 = arith.constant 0 : index
    %c0_7 = arith.constant 0 : index
    %20 = vector.load %arg1[%c0_5, %c0_6, %c0_7] : memref<1x4x256xf32, #tpu.memory_space<vmem>>, vector<1x4x256xf32>
    %21 = vector.shape_cast %20 : vector<1x4x256xf32> to vector<4x256xf32>
    %c0_8 = arith.constant 0 : index
    %c128 = arith.constant 128 : index
    %22 = vector.load %arg9[%c0_8, %c128] : memref<4x512xf32, #tpu.memory_space<vmem>>, vector<4x256xf32>
    tpu.vector_store %arg9[%c0_8, %c128], %21 {strides = array<i32>} : memref<4x512xf32, #tpu.memory_space<vmem>>, vector<4x256xf32>,
    %c11_i32 = arith.constant 11 : i32
    %23 = vector.broadcast %c11_i32 : i32 to vector<1x256xi32>
    %24 = arith.cmpi slt, %19, %23 : vector<1x256xi32>
    %c5_i32 = arith.constant 5 : i32
    %25 = vector.broadcast %c5_i32 : i32 to vector<1x256xi32>
    %26 = arith.cmpi sge, %19, %25 : vector<1x256xi32>
    %c0_9 = arith.constant 0 : index
    %c43 = arith.constant 43 : index
    %27 = vector.load %arg9[%c0_9, %c43] : memref<4x512xf32, #tpu.memory_space<vmem>>, vector<4x256xf32>
    %cst_10 = arith.constant 0.000000e+00 : f32
    %28 = vector.shape_cast %26 : vector<1x256xi1> to vector<1x256xi1>
    %29 = vector.broadcast %28 : vector<1x256xi1> to vector<4x256xi1>
    %30 = vector.broadcast %cst_10 : f32 to vector<4x256xf32>
    %31 = arith.select %29, %27, %30 : vector<4x256xi1>, vector<4x256xf32>
    %c0_11 = arith.constant 0 : index
    %c48 = arith.constant 48 : index
    %32 = vector.load %arg9[%c0_11, %c48] : memref<4x512xf32, #tpu.memory_space<vmem>>, vector<4x256xf32>
    %c0_12 = arith.constant 0 : index
    %c53 = arith.constant 53 : index
    %33 = vector.load %arg9[%c0_12, %c53] : memref<4x512xf32, #tpu.memory_space<vmem>>, vector<4x256xf32>
    %cst_13 = arith.constant 0.000000e+00 : f32
    %34 = vector.shape_cast %24 : vector<1x256xi1> to vector<1x256xi1>
    %35 = vector.broadcast %34 : vector<1x256xi1> to vector<4x256xi1>
    %36 = vector.broadcast %cst_13 : f32 to vector<4x256xf32>
    %37 = arith.select %35, %33, %36 : vector<4x256xi1>, vector<4x256xf32>
    %c0_14 = arith.constant 0 : index
    %c123 = arith.constant 123 : index
    %38 = vector.load %arg9[%c0_14, %c123] : memref<4x512xf32, #tpu.memory_space<vmem>>, vector<4x256xf32>
    %cst_15 = arith.constant 0.000000e+00 : f32
    %39 = vector.shape_cast %26 : vector<1x256xi1> to vector<1x256xi1>
    %40 = vector.broadcast %39 : vector<1x256xi1> to vector<4x256xi1>
    %41 = vector.broadcast %cst_15 : f32 to vector<4x256xf32>
    %42 = arith.select %40, %38, %41 : vector<4x256xi1>, vector<4x256xf32>
    %c0_16 = arith.constant 0 : index
    %c128_17 = arith.constant 128 : index
    %43 = vector.load %arg9[%c0_16, %c128_17] : memref<4x512xf32, #tpu.memory_space<vmem>>, vector<4x256xf32>
    %c0_18 = arith.constant 0 : index
    %c133 = arith.constant 133 : index
    %44 = vector.load %arg9[%c0_18, %c133] : memref<4x512xf32, #tpu.memory_space<vmem>>, vector<4x256xf32>
    %cst_19 = arith.constant 0.000000e+00 : f32
    %45 = vector.shape_cast %24 : vector<1x256xi1> to vector<1x256xi1>
    %46 = vector.broadcast %45 : vector<1x256xi1> to vector<4x256xi1>
    %47 = vector.broadcast %cst_19 : f32 to vector<4x256xf32>
    %48 = arith.select %46, %44, %47 : vector<4x256xi1>, vector<4x256xf32>
    %c0_20 = arith.constant 0 : index
    %c203 = arith.constant 203 : index
    %49 = vector.load %arg9[%c0_20, %c203] : memref<4x512xf32, #tpu.memory_space<vmem>>, vector<4x256xf32>
    %cst_21 = arith.constant 0.000000e+00 : f32
    %50 = vector.shape_cast %26 : vector<1x256xi1> to vector<1x256xi1>
    %51 = vector.broadcast %50 : vector<1x256xi1> to vector<4x256xi1>
    %52 = vector.broadcast %cst_21 : f32 to vector<4x256xf32>
    %53 = arith.select %51, %49, %52 : vector<4x256xi1>, vector<4x256xf32>
    %c0_22 = arith.constant 0 : index
    %c208 = arith.constant 208 : index
    %54 = vector.load %arg9[%c0_22, %c208] : memref<4x512xf32, #tpu.memory_space<vmem>>, vector<4x256xf32>
    %c0_23 = arith.constant 0 : index
    %c213 = arith.constant 213 : index
    %55 = vector.load %arg9[%c0_23, %c213] : memref<4x512xf32, #tpu.memory_space<vmem>>, vector<4x256xf32>
    %cst_24 = arith.constant 0.000000e+00 : f32
    %56 = vector.shape_cast %24 : vector<1x256xi1> to vector<1x256xi1>
    %57 = vector.broadcast %56 : vector<1x256xi1> to vector<4x256xi1>
    %58 = vector.broadcast %cst_24 : f32 to vector<4x256xf32>
    %59 = arith.select %57, %55, %58 : vector<4x256xi1>, vector<4x256xf32>
    %60 = tpu.concatenate %31, %32, %37, %42, %43, %48, %53, %54, %59 in 0 : vector<4x256xf32>, vector<4x256xf32>, vector<4x256xf32>, vector<4x256xf32>, vector<4x256xf32>, vector<4x256xf32>, vector<4x256xf32>, vector<4x256xf32>, vector<4x256xf32> -> vector<36x256xf32>
    %c0_25 = arith.constant 0 : index
    %c0_26 = arith.constant 0 : index
    %61 = vector.load %arg2[%c0_25, %c0_26] : memref<4x36xf32, #tpu.memory_space<vmem>>, vector<4x36xf32>
    %cst_27 = arith.constant dense<0.000000e+00> : vector<4x256xf32>
    %62 = tpu.matmul %61, %60, %cst_27 {dimension_numbers = #tpu.dot_dimension_numbers<[1], [0], [0], [1], [0, 0, 1, 1], [], []>} : vector<4x36xf32>, vector<36x256xf32>, vector<4x256xf32> -> vector<4x256xf32>
    %c0_28 = arith.constant 0 : index
    %c0_29 = arith.constant 0 : index
    %63 = vector.load %arg3[%c0_28, %c0_29] : memref<4x1xf32, #tpu.memory_space<vmem>>, vector<4x1xf32>
    %64 = vector.broadcast %63 : vector<4x1xf32> to vector<4x256xf32>
    %65 = arith.addf %62, %64 : vector<4x256xf32>
    %cst_30 = arith.constant 0.000000e+00 : f32
    %66 = vector.broadcast %cst_30 : f32 to vector<4x256xf32>
    %67 = arith.maximumf %65, %66 : vector<4x256xf32>
    %c0_31 = arith.constant 0 : index
    %c128_32 = arith.constant 128 : index
    %68 = vector.load %arg9[%c0_31, %c128_32] : memref<4x512xf32, #tpu.memory_space<vmem>>, vector<4x256xf32>
    tpu.vector_store %arg9[%c0_31, %c128_32], %67 {strides = array<i32>} : memref<4x512xf32, #tpu.memory_space<vmem>>, vector<4x256xf32>,
    %c15_i32 = arith.constant 15 : i32
    %69 = vector.broadcast %c15_i32 : i32 to vector<1x256xi32>
    %70 = arith.cmpi slt, %19, %69 : vector<1x256xi32>
    %c1_i32_33 = arith.constant 1 : i32
    %71 = vector.broadcast %c1_i32_33 : i32 to vector<1x256xi32>
    %72 = arith.cmpi sge, %19, %71 : vector<1x256xi32>
    %c0_34 = arith.constant 0 : index
    %c111 = arith.constant 111 : index
    %73 = vector.load %arg9[%c0_34, %c111] : memref<4x512xf32, #tpu.memory_space<vmem>>, vector<4x256xf32>
    %cst_35 = arith.constant 0.000000e+00 : f32
    %74 = vector.shape_cast %72 : vector<1x256xi1> to vector<1x256xi1>
    %75 = vector.broadcast %74 : vector<1x256xi1> to vector<4x256xi1>
    %76 = vector.broadcast %cst_35 : f32 to vector<4x256xf32>
    %77 = arith.select %75, %73, %76 : vector<4x256xi1>, vector<4x256xf32>
    %c0_36 = arith.constant 0 : index
    %c112 = arith.constant 112 : index
    %78 = vector.load %arg9[%c0_36, %c112] : memref<4x512xf32, #tpu.memory_space<vmem>>, vector<4x256xf32>
    %c0_37 = arith.constant 0 : index
    %c113 = arith.constant 113 : index
    %79 = vector.load %arg9[%c0_37, %c113] : memref<4x512xf32, #tpu.memory_space<vmem>>, vector<4x256xf32>
    %cst_38 = arith.constant 0.000000e+00 : f32
    %80 = vector.shape_cast %70 : vector<1x256xi1> to vector<1x256xi1>
    %81 = vector.broadcast %80 : vector<1x256xi1> to vector<4x256xi1>
    %82 = vector.broadcast %cst_38 : f32 to vector<4x256xf32>
    %83 = arith.select %81, %79, %82 : vector<4x256xi1>, vector<4x256xf32>
    %c0_39 = arith.constant 0 : index
    %c127 = arith.constant 127 : index
    %84 = vector.load %arg9[%c0_39, %c127] : memref<4x512xf32, #tpu.memory_space<vmem>>, vector<4x256xf32>
    %cst_40 = arith.constant 0.000000e+00 : f32
    %85 = vector.shape_cast %72 : vector<1x256xi1> to vector<1x256xi1>
    %86 = vector.broadcast %85 : vector<1x256xi1> to vector<4x256xi1>
    %87 = vector.broadcast %cst_40 : f32 to vector<4x256xf32>
    %88 = arith.select %86, %84, %87 : vector<4x256xi1>, vector<4x256xf32>
    %c0_41 = arith.constant 0 : index
    %c128_42 = arith.constant 128 : index
    %89 = vector.load %arg9[%c0_41, %c128_42] : memref<4x512xf32, #tpu.memory_space<vmem>>, vector<4x256xf32>
    %c0_43 = arith.constant 0 : index
    %c129 = arith.constant 129 : index
    %90 = vector.load %arg9[%c0_43, %c129] : memref<4x512xf32, #tpu.memory_space<vmem>>, vector<4x256xf32>
    %cst_44 = arith.constant 0.000000e+00 : f32
    %91 = vector.shape_cast %70 : vector<1x256xi1> to vector<1x256xi1>
    %92 = vector.broadcast %91 : vector<1x256xi1> to vector<4x256xi1>
    %93 = vector.broadcast %cst_44 : f32 to vector<4x256xf32>
    %94 = arith.select %92, %90, %93 : vector<4x256xi1>, vector<4x256xf32>
    %c0_45 = arith.constant 0 : index
    %c143 = arith.constant 143 : index
    %95 = vector.load %arg9[%c0_45, %c143] : memref<4x512xf32, #tpu.memory_space<vmem>>, vector<4x256xf32>
    %cst_46 = arith.constant 0.000000e+00 : f32
    %96 = vector.shape_cast %72 : vector<1x256xi1> to vector<1x256xi1>
    %97 = vector.broadcast %96 : vector<1x256xi1> to vector<4x256xi1>
    %98 = vector.broadcast %cst_46 : f32 to vector<4x256xf32>
    %99 = arith.select %97, %95, %98 : vector<4x256xi1>, vector<4x256xf32>
    %c0_47 = arith.constant 0 : index
    %c144 = arith.constant 144 : index
    %100 = vector.load %arg9[%c0_47, %c144] : memref<4x512xf32, #tpu.memory_space<vmem>>, vector<4x256xf32>
    %c0_48 = arith.constant 0 : index
    %c145 = arith.constant 145 : index
    %101 = vector.load %arg9[%c0_48, %c145] : memref<4x512xf32, #tpu.memory_space<vmem>>, vector<4x256xf32>
    %cst_49 = arith.constant 0.000000e+00 : f32
    %102 = vector.shape_cast %70 : vector<1x256xi1> to vector<1x256xi1>
    %103 = vector.broadcast %102 : vector<1x256xi1> to vector<4x256xi1>
    %104 = vector.broadcast %cst_49 : f32 to vector<4x256xf32>
    %105 = arith.select %103, %101, %104 : vector<4x256xi1>, vector<4x256xf32>
    %106 = tpu.concatenate %77, %78, %83, %88, %89, %94, %99, %100, %105 in 0 : vector<4x256xf32>, vector<4x256xf32>, vector<4x256xf32>, vector<4x256xf32>, vector<4x256xf32>, vector<4x256xf32>, vector<4x256xf32>, vector<4x256xf32>, vector<4x256xf32> -> vector<36x256xf32>
    %c0_50 = arith.constant 0 : index
    %c0_51 = arith.constant 0 : index
    %107 = vector.load %arg4[%c0_50, %c0_51] : memref<4x36xf32, #tpu.memory_space<vmem>>, vector<4x36xf32>
    %cst_52 = arith.constant dense<0.000000e+00> : vector<4x256xf32>
    %108 = tpu.matmul %107, %106, %cst_52 {dimension_numbers = #tpu.dot_dimension_numbers<[1], [0], [0], [1], [0, 0, 1, 1], [], []>} : vector<4x36xf32>, vector<36x256xf32>, vector<4x256xf32> -> vector<4x256xf32>
    %c0_53 = arith.constant 0 : index
    %c0_54 = arith.constant 0 : index
    %109 = vector.load %arg5[%c0_53, %c0_54] : memref<4x1xf32, #tpu.memory_space<vmem>>, vector<4x1xf32>
    %110 = vector.broadcast %109 : vector<4x1xf32> to vector<4x256xf32>
    %111 = arith.addf %108, %110 : vector<4x256xf32>
    %cst_55 = arith.constant 0.000000e+00 : f32
    %112 = vector.broadcast %cst_55 : f32 to vector<4x256xf32>
    %113 = arith.maximumf %111, %112 : vector<4x256xf32>
    %c0_56 = arith.constant 0 : index
    %c0_57 = arith.constant 0 : index
    %114 = vector.load %arg6[%c0_56, %c0_57] : memref<8x4xf32, #tpu.memory_space<vmem>>, vector<8x4xf32>
    %cst_58 = arith.constant dense<0.000000e+00> : vector<8x256xf32>
    %115 = tpu.matmul %114, %113, %cst_58 {dimension_numbers = #tpu.dot_dimension_numbers<[1], [0], [0], [1], [0, 0, 1, 1], [], []>} : vector<8x4xf32>, vector<4x256xf32>, vector<8x256xf32> -> vector<8x256xf32>
    %c0_59 = arith.constant 0 : index
    %c0_60 = arith.constant 0 : index
    %116 = vector.load %arg7[%c0_59, %c0_60] : memref<8x1xf32, #tpu.memory_space<vmem>>, vector<8x1xf32>
    %117 = vector.broadcast %116 : vector<8x1xf32> to vector<8x256xf32>
    %118 = arith.addf %115, %117 : vector<8x256xf32>
    %c0_61 = arith.constant 0 : index
    %c0_62 = arith.constant 0 : index
    %c0_63 = arith.constant 0 : index
    %119 = vector.load %arg8[%c0_61, %c0_62, %c0_63] : memref<1x8x256xf32, #tpu.memory_space<vmem>>, vector<1x8x256xf32>
    %120 = vector.shape_cast %119 : vector<1x8x256xf32> to vector<8x256xf32>
    %121 = vector.shape_cast %118 : vector<8x256xf32> to vector<1x8x256xf32>
    tpu.vector_store %arg8[%c0_61, %c0_62, %c0_63], %121 {strides = array<i32>} : memref<1x8x256xf32, #tpu.memory_space<vmem>>, vector<1x8x256xf32>,
    return
  }
  func.func @transform_0(%arg0: i32) -> (i32, i32, i32) {
    %c0_i32 = arith.constant 0 : i32
    %c0_i32_0 = arith.constant 0 : i32
    %c0_i32_1 = arith.constant 0 : i32
    return %arg0, %c0_i32, %c0_i32_0 : i32, i32, i32
  }
  func.func @transform_1(%arg0: i32) -> (i32, i32) {
    %c0_i32 = arith.constant 0 : i32
    %c0_i32_0 = arith.constant 0 : i32
    %c0_i32_1 = arith.constant 0 : i32
    return %c0_i32, %c0_i32_0 : i32, i32
  }
  func.func @transform_2(%arg0: i32) -> (i32, i32) {
    %c0_i32 = arith.constant 0 : i32
    %c0_i32_0 = arith.constant 0 : i32
    %c0_i32_1 = arith.constant 0 : i32
    return %c0_i32, %c0_i32_0 : i32, i32
  }
  func.func @transform_3(%arg0: i32) -> (i32, i32) {
    %c0_i32 = arith.constant 0 : i32
    %c0_i32_0 = arith.constant 0 : i32
    %c0_i32_1 = arith.constant 0 : i32
    return %c0_i32, %c0_i32_0 : i32, i32
  }
  func.func @transform_4(%arg0: i32) -> (i32, i32) {
    %c0_i32 = arith.constant 0 : i32
    %c0_i32_0 = arith.constant 0 : i32
    %c0_i32_1 = arith.constant 0 : i32
    return %c0_i32, %c0_i32_0 : i32, i32
  }
  func.func @transform_5(%arg0: i32) -> (i32, i32) {
    %c0_i32 = arith.constant 0 : i32
    %c0_i32_0 = arith.constant 0 : i32
    %c0_i32_1 = arith.constant 0 : i32
    return %c0_i32, %c0_i32_0 : i32, i32
  }
  func.func @transform_6(%arg0: i32) -> (i32, i32) {
    %c0_i32 = arith.constant 0 : i32
    %c0_i32_0 = arith.constant 0 : i32
    %c0_i32_1 = arith.constant 0 : i32
    return %c0_i32, %c0_i32_0 : i32, i32
  }
  func.func @transform_7(%arg0: i32) -> (i32, i32, i32) {
    %c0_i32 = arith.constant 0 : i32
    %c0_i32_0 = arith.constant 0 : i32
    %c0_i32_1 = arith.constant 0 : i32
    return %arg0, %c0_i32, %c0_i32_0 : i32, i32, i32
  }
}

</mosaic_0001>

<bundles_post_ra>
// kernel: tpu_custom_call.1
= control target key start
LH: loop header
LB: loop body
LE: loop exit
PB: predicated region body
PF: predicated region fallthrough
CT: control target
= control target key end

     0   :  { %12 = vsyncpa [#allocation4], 0  ;;  %s1419_s0 = inlined_call_operand.vmem [shape: f32[2,4,256], index: 0, kind: input, shape index: {}]   ;;  %s1420_s1 = inlined_call_operand.vmem [shape: f32[4,36], index: 1, kind: input, shape index: {}]   ;;  %s1421_s2 = inlined_call_operand.vmem [shape: f32[4,1], index: 2, kind: input, shape index: {}]   ;;  %s1422_s3 = inlined_call_operand.vmem [shape: f32[4,36], index: 3, kind: input, shape index: {}]   ;;  %s1423_s4 = inlined_call_operand.vmem [shape: f32[4,1], index: 4, kind: input, shape index: {}]   ;;  %s1424_s5 = inlined_call_operand.vmem [shape: f32[8,4], index: 5, kind: input, shape index: {}]   ;;  %s1425_s6 = inlined_call_operand.vmem [shape: f32[8,1], index: 6, kind: input, shape index: {}]   ;;  %s1426_s7 = inlined_call_operand.hbm [shape: f32[2,8,256], index: 7, kind: output, shape index: {}]  }
   0x1   :  { %14 = vsyncpa [#allocation4 + $0x1], 0  ;;  %s1171_s24 = smov 0   ;;  %s1173_s25 = smov 0  }
   0x2   :  { %s1175_s26 = smov 0   ;;  %s1177_s27 = smov 0  }
   0x3 LB: > { %s1192_s28 = sadd.s32 4294967295, %s1110_s27   ;;  %s957_s29 = sadd.s32 4294967294, %s1110_s27   ;;  %s1110_s27 = sphi %s1177_s27, %s1432_s27   ;;  %s1106_s26 = sphi %s1175_s26, %s1431_s26   ;;  %s1102_s25 = sphi %s1173_s25, %s1430_s25   ;;  %s1098_s24 = sphi %s1171_s24, %s1429_s24  }
   0x4   : > { %s1196_s30 = sadd.s32 1, %s1110_s27   ;;  %s179_s8 = sadd.s32 1, %s1106_s26 }
   0x5   : > { %s176_s9 = ssub.s32 %s1110_s27, %s1196_s30  ;;  %p189_p0 = scmp.ne.s32.totalorder %s1106_s26, %s1102_s25 }
   0x6   : > { %p177_p1 = scmp.eq.s32.totalorder %s176_s9, 0  ;;  %p190_p2 = scmp.eq.s32.totalorder %s1192_s28, 1 }
   0x7   : > { %p195_p3 = scmp.ne.s32.totalorder %s1102_s25, %s1098_s24  ;;  %p196_p4 = scmp.eq.s32.totalorder %s957_s29, 1 }
   0x8   : > { %s1207_s10 = scalar_select %p177_p1, %s1106_s26, %s179_s8  }
   0x9   : > { %p1209_p5 = por %p190_p2, %p189_p0  ;;  %p1213_p6 = por %p196_p4, %p195_p3 }
   0xa   : > { %p960_p7 = scmp.ge.s32.totalorder %s1110_s27, 1  ;;  %p240_p8 = scmp.lt.s32.totalorder %s1110_s27, 3 }
   0xc   : > { %p241_p9 = pnand %p960_p7, %p240_p8 }
   0xd   : > { %p272_p10 = scmp.lt.s32.totalorder (!%p241_p9), %s1192_s28, 1  ;;  %s1113_s18 = smov (!%p241_p9), 123  }
   0xe   : > { %244 = sbr.rel (%p241_p9) target bundleno = 958 (0x3be), region = 48  ;;  %s1114_s19 = smov (!%p241_p9), 43  }
   0xf   : > { %s1115_s20 = smov (!%p241_p9), 53   ;;  %s1116_s21 = smov (!%p241_p9), 48  }
  0x10   : > { %s1117_s22 = smov (!%p241_p9), 5   ;;  %s1118_s23 = smov (!%p241_p9), 75  }
  0x11   : > { %s1119_s29 = smov (!%p241_p9), 85   ;;  %s1121_s8 = smov (!%p241_p9), 80  }
  0x12   : > { %s1122_s16 = smov (!%p241_p9), 111  }
  0x13   : > { %v1112_v0 = vmov 0.0   ;;  %s273_s13 = scalar_select %p272_p10, %s1192_s28, 1  ;;  %v1120_v9 = vmov 0   ;;  %v460_v12 = vld [vmem:[%s1421_s2] sm:$0xf]  ;;  %v279_v13 = vlaneseq  ;;  %vm402_vm0 = vcmask 351232  }
  0x14   : > { %278 = vst [vmem:[#allocation2 + $0xc] sm:$0xf] %v1112_v0  ;;  %277 = vst [vmem:[#allocation2] sm:$0xf] %v1112_v0  ;;  %540 = vmatprep.mubr.f32.mxu0 %v1112_v0  ;;  %784 = vmatprep.mubr.f32.mxu1 %v1112_v0  ;;  %vm450_vm3 = vcmask 1043456   ;;  %vm376_vm4 = vcmask 1006592  }
  0x15   : > { %s978_s14 = sshll.u32 %s273_s13, 3  ;;  %1037 = vset.pattern.permute.xlu0 %v1120_v9  ;;  %1038 = vset.pattern.permute.xlu1 %v1120_v9  ;;  %v280_v14 = vand.u32 127, %v279_v13  ;;  %vm389_vm5 = vcmask 433152   ;;  %vm445_vm7 = vcmask 392192   ;;  %vm357_vm9 = vcmask 39936  }
  0x16   : > { %s276_s17 = scalar_lea.vmem %s1419_s0, %s978_s14  ;;  %vm344_vm10 = vcmask 613376   ;;  %vm327_vm11 = vcmask 695296   ;;  %vm417_vm12 = vcmask 654336   ;;  %vm466_vm13 = vcmask 293888   ;;  %s1130_s14 = smov [#allocation3]  }
  0x17   : > { %v1228_v1 = vld [vmem:[%s276_s17] sm:$0xff]  ;;  %v281_v17 = vadd.s32 128, %v280_v14  ;;  %v1247_v20 = vand.u32 15, %v280_v14  ;;  %s1123_s17 = smov 127   ;;  %vm648_vm14 = vcmask 908288  }
  0x18   : > { %307 = vst [vmem:[#allocation2 + $0x4] sm:$0xff] %v1228_v1  ;;  %v1236_v3 = vcombine.high %v1228_v1, %v1228_v1  ;;  %v437_v7 = vcombine.low %v1228_v1, %v1228_v1 }
  0x19   : > { %v1249_v21 = vand.u32 15, %v281_v17  ;;  %vm308_vm1 = vcmp.lt.s32.totalorder %v1247_v20, 11  ;;  %vm310_vm8 = vcmp.ge.s32.totalorder %v1247_v20, 5 }
  0x1b   : > { %v366_v2 = vld [vmem:[#allocation2 + $0xc] sm:$0xf]  ;;  %vm309_vm2 = vcmp.lt.s32.totalorder %v1249_v21, 11  ;;  %vm311_vm6 = vcmp.ge.s32.totalorder %v1249_v21, 5  ;;  %vm555_vm15 = vcmp.lt.s32.totalorder %v1249_v21, 15 }
  0x1c   : > { %374 = vrot.lane.b32.xlu1 %v366_v2, %s1113_s18  ;;  %400 = vrot.lane.b32.xlu0 %v366_v2, %s1114_s19  ;;  %v438_v6 = vcombine.low %v366_v2, %v366_v2 }
  0x1f   : > { %v312_v4 = vld [vmem:[#allocation2] sm:$0xff]  ;;  %v313_v8 = vld [vmem:[#allocation2 + $0x8] sm:$0xf] }
  0x20   : > { %387 = vrot.lane.b32.xlu1 %v366_v2, %s1115_s20  ;;  %396 = vrot.lane.b32.xlu0 %v1228_v1, %s1114_s19  ;;  %v320_v5 = vcombine.high %v312_v4, %v312_v4  ;;  %v409_v10 = vcombine.low %v312_v4, %v312_v4  ;;  %v410_v11 = vcombine.low %v313_v8, %v313_v8 }
  0x24   : > { %370 = vrot.lane.b32.xlu1 %v1228_v1, %s1113_s18  ;;  %383 = vrot.lane.b32.xlu0 %v1228_v1, %s1115_s20 }
  0x28   : > { %441 = vrot.lane.b32.xlu1 %v1228_v1, %s1116_s21  ;;  %398 = vrot.lane.b32.xlu0 %v1236_v3, %s1114_s19  ;;  %s1125_s19 = smov 113  }
  0x2c   : > { %372 = vrot.lane.b32.xlu1 %v1236_v3, %s1113_s18  ;;  %385 = vrot.lane.b32.xlu0 %v1236_v3, %s1115_s20  ;;  %s1124_s18 = smov 112   ;;  %s1126_s20 = smov 1  }
  0x30   : > { %353 = vrot.lane.b32.xlu1 %v320_v5, %s1117_s22  ;;  %443 = vrot.lane.b32.xlu0 %v438_v6, %s1116_s21 }
  0x34   : > { %439 = vrot.lane.b32.xlu1 %v437_v7, %s1116_s21  ;;  %355 = vrot.lane.b32.xlu0 %v313_v8, %s1117_s22  ;;  %s1127_s21 = smov 15  }
  0x38   : > { %340 = vrot.lane.b32.xlu1 %v320_v5, %s1118_s23  ;;  %351 = vrot.lane.b32.xlu0 %v312_v4, %s1117_s22  ;;  %s1128_s22 = smov 17  }
  0x3c   : > { %338 = vrot.lane.b32.xlu1 %v312_v4, %s1118_s23  ;;  %342 = vrot.lane.b32.xlu0 %v313_v8, %s1118_s23  ;;  %s1129_s23 = smov 16  }
  0x40   : > { %325 = vrot.lane.b32.xlu1 %v313_v8, %s1119_s29  ;;  %323 = vrot.lane.b32.xlu0 %v320_v5, %s1119_s29 }
  0x44   : > { %413 = vrot.lane.b32.xlu1 %v312_v4, %s1121_s8  ;;  %321 = vrot.lane.b32.xlu0 %v312_v4, %s1119_s29 }
  0x48   : > { %411 = vrot.lane.b32.xlu1 %v409_v10, %s1121_s8  ;;  %415 = vrot.lane.b32.xlu0 %v410_v11, %s1121_s8 }
  0x4c   : > { %463 = vperm.xlu0 %1037, %v460_v12  }
  0x8e   : > { %v375_v15 = vpop.permute.xlu1 %374  ;;  %v401_v16 = vpop.permute.xlu0 %400 }
  0x92   : > { %v388_v18 = vpop.permute.xlu1 %387  ;;  %v397_v19 = vpop.permute.xlu0 %396 }
  0x96   : > { %v371_v22 = vpop.permute.xlu1 %370  ;;  %v384_v23 = vpop.permute.xlu0 %383 }
  0x9a   : > { %v442_v24 = vpop.permute.xlu1 %441  ;;  %v399_v25 = vpop.permute.xlu0 %398 }
  0x9b   : > { %v403_v26 = vsel %vm402_vm0, %v397_v19, %v399_v25  ;;  %v404_v27 = vsel %vm402_vm0, %v399_v25, %v401_v16  ;;  %v459_v19 = vld [vmem:[%s1420_s1] sm:$0xf]  ;;  %vm554_vm0 = vcmp.lt.s32.totalorder %v1247_v20, 15 }
  0x9c   : > { %v408_v28 = vsel %vm309_vm2, %v404_v27, 0.0  ;;  %v407_v29 = vsel %vm308_vm1, %v403_v26, 0.0 }
  0x9d   : > { %964 = vmatprep.subr.msk.mxu0 %vm450_vm3, %v408_v28 }
  0x9e   : > { %v373_v30 = vpop.permute.xlu1 %372  ;;  %965 = vmatpush1.msk.msra.mxu0 %vm450_vm3, %v407_v29  ;;  %v386_v31 = vpop.permute.xlu0 %385 }
  0x9f   : > { %v378_v32 = vsel %vm376_vm4, %v373_v30, %v375_v15  ;;  %v377_v33 = vsel %vm376_vm4, %v371_v22, %v373_v30  ;;  %v391_v34 = vsel %vm389_vm5, %v386_v31, %v388_v18  ;;  %v390_v41 = vsel %vm389_vm5, %v384_v23, %v386_v31  ;;  %v612_v22 = vld [vmem:[#allocation2 + $0xc] sm:$0xf] }
  0xa0   : > { %v382_v35 = vsel %vm309_vm2, %v378_v32, 0.0  ;;  %v381_v38 = vsel %vm308_vm1, %v377_v33, 0.0  ;;  %v395_v39 = vsel %vm311_vm6, %v391_v34, 0.0  ;;  %v394_v47 = vsel %vm310_vm8, %v390_v41, 0.0  ;;  %646 = vrot.lane.b32.xlu1 %v612_v22, %s1122_s16 }
  0xa1   : > { %v434_v43 = vrot.slane %v382_v35, 4  ;;  %v433_v44 = vrot.slane %v381_v38, 4  ;;  %v684_v23 = vcombine.low %v612_v22, %v612_v22  ;;  %v705_v38 = vld [vmem:[%s1423_s4] sm:$0xf]  ;;  %vm556_vm4 = vcmp.ge.s32.totalorder %v1247_v20, 1 }
  0xa2   : > { %v354_v36 = vpop.permute.xlu1 %353  ;;  %v444_v37 = vpop.permute.xlu0 %443  ;;  %vm557_vm5 = vcmp.ge.s32.totalorder %v1249_v21, 1  ;;  %v794_v20 = vld [vmem:[%s1425_s6] sm:$0xff] }
  0xa3   : > { %v447_v40 = vsel %vm445_vm7, %v442_v24, %v444_v37  ;;  %v456_v51 = vsel %vm450_vm3, %v1236_v3, %v434_v43  ;;  %v455_v53 = vsel %vm450_vm3, %v1228_v1, %v433_v44  ;;  %689 = vrot.lane.b32.xlu0 %v684_v23, %s1124_s18 }
  0xa4   : > { %v458_v42 = vsel %vm450_vm3, %v395_v39, %v447_v40  ;;  %620 = vrot.lane.b32.xlu1 %v612_v22, %s1123_s17 }
  0xa5   : > { %500 = vmatprep.subr.mxu0 %v458_v42 }
  0xa6   : > { %v440_v45 = vpop.permute.xlu1 %439  ;;  %v356_v46 = vpop.permute.xlu0 %355 }
  0xa7   : > { %v446_v48 = vsel %vm445_vm7, %v440_v45, %v442_v24  ;;  %v359_v50 = vsel %vm357_vm9, %v354_v36, %v356_v46  ;;  %vm691_vm7 = vcmask 916480  }
  0xa8   : > { %v457_v49 = vsel %vm450_vm3, %v394_v47, %v446_v48  ;;  %v363_v56 = vsel %vm311_vm6, %v359_v50, 0.0  ;;  %633 = vrot.lane.b32.xlu1 %v612_v22, %s1125_s19 }
  0xa9   : > { %501 = vmatpush1.msra.mxu0 %v457_v49  ;;  %v425_v60 = vrot.slane %v363_v56, 4 }
  0xaa   : > { %502 = vmatprep.subr.mxu0 %v456_v51  ;;  %v341_v52 = vpop.permute.xlu1 %340  ;;  %v352_v54 = vpop.permute.xlu0 %351 }
  0xab   : > { %503 = vmatpush1.msra.mxu0 %v455_v53  ;;  %v358_v55 = vsel %vm357_vm9, %v352_v54, %v354_v36  ;;  %vm573_vm9 = vcmask 138240  }
  0xac   : > { %v362_v57 = vsel %vm310_vm8, %v358_v55, 0.0 }
  0xad   : > { %v424_v61 = vrot.slane %v362_v57, 4 }
  0xae   : > { %v339_v58 = vpop.permute.xlu1 %338  ;;  %v343_v59 = vpop.permute.xlu0 %342 }
  0xaf   : > { %v345_v62 = vsel %vm344_vm10, %v339_v58, %v341_v52  ;;  %v346_v63 = vsel %vm344_vm10, %v341_v52, %v343_v59  ;;  %vm663_vm10 = vcmask 130048  }
  0xb0   : > { %v349_v2 = vsel %vm308_vm1, %v345_v62, 0.0  ;;  %v350_v1 = vsel %vm309_vm2, %v346_v63, 0.0  ;;  %vm622_vm1 = vcmask 1039360   ;;  %vm603_vm2 = vcmask 7168  }
  0xb1   : > { %v454_v3 = vsel %vm450_vm3, %v350_v1, %v425_v60  ;;  %v453_v4 = vsel %vm450_vm3, %v349_v2, %v424_v61 }
  0xb2   : > { %v326_v5 = vpop.permute.xlu1 %325  ;;  %v324_v6 = vpop.permute.xlu0 %323  ;;  %504 = vmatprep.subr.mxu0 %v454_v3 }
  0xb3   : > { %505 = vmatpush1.msra.mxu0 %v453_v4  ;;  %v329_v9 = vsel %vm327_vm11, %v324_v6, %v326_v5 }
  0xb4   : > { %v333_v13 = vsel %vm311_vm6, %v329_v9, 0.0  ;;  %vm635_vm6 = vcmask 924672  }
  0xb6   : > { %v414_v7 = vpop.permute.xlu1 %413  ;;  %v322_v8 = vpop.permute.xlu0 %321 }
  0xb7   : > { %v328_v10 = vsel %vm327_vm11, %v322_v8, %v324_v6  ;;  %vm800_vm11 = vcmask 31744  }
  0xb8   : > { %v332_v14 = vsel %vm310_vm8, %v328_v10, 0.0  ;;  %vm590_vm8 = vcmask 121856  }
  0xba   : > { %v412_v11 = vpop.permute.xlu1 %411  ;;  %v416_v12 = vpop.permute.xlu0 %415 }
  0xbb   : > { %v418_v15 = vsel %vm417_vm12, %v412_v11, %v414_v7  ;;  %v419_v16 = vsel %vm417_vm12, %v414_v7, %v416_v12 }
  0xbc   : > { %v452_v17 = vsel %vm450_vm3, %v333_v13, %v419_v16  ;;  %v451_v18 = vsel %vm450_vm3, %v332_v14, %v418_v15 }
  0xbd   : > { %506 = vmatprep.subr.mxu0 %v452_v17 }
  0xbe   : > { %507 = vmatpush1.msra.mxu0 %v451_v18 }
  0xbf   : > { %966 = vmatmul.mubr.msk.f32.vlgmr.msra.gmra.mxu0 %vm466_vm13, %v459_v19 }
  0xc0   : > { %874 = vmatprep.mubr.f32.mxu0 %v1112_v0 }
  0xc7   : > { %v464_v24 = vpop.permute.xlu0 %463 }
 0x112   : > { %v647_v39 = vpop.permute.xlu1 %646 }
 0x115   : > { %v690_v41 = vpop.permute.xlu0 %689 }
 0x116   : > { %v621_v40 = vpop.permute.xlu1 %620 }
 0x11a   : > { %v634_v42 = vpop.permute.xlu1 %633 }
 0x17f   : > { %v542_v25 = vpop.f32.mrf.mxu0 }
 0x180   : > { %v543_v26 = vadd.f32 %v542_v25, %v464_v24 }
 0x181   : > { %v544_v27 = vpop.f32.mrf.mxu0 }
 0x182   : > { %v545_v28 = vadd.f32 %v544_v27, %v464_v24  ;;  %v547_v0 = vmax.f32 %v543_v26, 0.0 }
 0x184   : > { %v548_v29 = vmax.f32 %v545_v28, 0.0  ;;  %v1049_v35 = vcombine.low %v547_v0, %v547_v0 }
 0x186   : > { %v1304_v30 = vcombine.low %v547_v0, %v548_v29  ;;  %v1315_v33 = vcombine.low %v548_v29, %v548_v29 }
 0x188   : > { %553 = vst [vmem:[#allocation2 + $0x4] sm:$0xff] %v1304_v30  ;;  %616 = vrot.lane.b32.xlu1 %v1304_v30, %s1123_s17  ;;  %642 = vrot.lane.b32.xlu0 %v1304_v30, %s1122_s16 }
 0x18c   : > { %687 = vrot.lane.b32.xlu1 %v1304_v30, %s1124_s18  ;;  %629 = vrot.lane.b32.xlu0 %v1304_v30, %s1125_s19 }
 0x18f   : > { %v559_v31 = vld [vmem:[#allocation2 + $0x8] sm:$0xf]  ;;  %v558_v32 = vld [vmem:[#allocation2] sm:$0xff] }
 0x190   : > { %601 = vrot.lane.b32.xlu0 %v559_v31, %s1126_s20  ;;  %584 = vrot.lane.b32.xlu1 %v558_v32, %s1127_s21  ;;  %v566_v34 = vcombine.high %v558_v32, %v558_v32  ;;  %v656_v36 = vcombine.low %v559_v31, %v559_v31  ;;  %v655_v37 = vcombine.low %v558_v32, %v558_v32 }
 0x194   : > { %571 = vrot.lane.b32.xlu1 %v559_v31, %s1128_s22  ;;  %597 = vrot.lane.b32.xlu0 %v558_v32, %s1126_s20 }
 0x198   : > { %659 = vrot.lane.b32.xlu1 %v558_v32, %s1129_s23  ;;  %588 = vrot.lane.b32.xlu0 %v559_v31, %s1127_s21 }
 0x19c   : > { %644 = vrot.lane.b32.xlu1 %v1315_v33, %s1122_s16  ;;  %567 = vrot.lane.b32.xlu0 %v558_v32, %s1128_s22 }
 0x1a0   : > { %618 = vrot.lane.b32.xlu0 %v1315_v33, %s1123_s17  ;;  %599 = vrot.lane.b32.xlu1 %v566_v34, %s1126_s20  ;;  %s979_s20 = sshll.u32 %s1192_s28, 8  ;;  %s1054_s28 = sshll.u32 %s1130_s14, 4  ;;  %s1055_s28 = int_to_ptr.vmem [resolvable:$false] %s1054_s28 }
 0x1a1   : > { %s896_s8 = scalar_lea.hbm %s1426_s7, %s979_s20  ;;  %s1056_s15 = scalar_lea.vmem %s1055_s28, 512 }
 0x1a4   : > { %631 = vrot.lane.b32.xlu0 %v1315_v33, %s1125_s19  ;;  %685 = vrot.lane.b32.xlu1 %v1049_v35, %s1124_s18  ;;  %s269_s18 = sand.u32 1, %s1102_s25  }
 0x1a5   : > { %s961_s19 = sshll.u32 %s269_s18, 4  ;;  %s884_s9 = scalar_lea.sflag [#allocation4], %s269_s18 }
 0x1a8   : > { %569 = vrot.lane.b32.xlu0 %v566_v34, %s1128_s22  ;;  %586 = vrot.lane.b32.xlu1 %v566_v34, %s1127_s21  ;;  %s271_s21 = scalar_lea.vmem [#allocation3], %s961_s19 }
 0x1a9   : > { %s898_s22 = sshll.u32 %s271_s21, 4  ;;  %s899_s22 = int_to_ptr.vmem [resolvable:$true] %s898_s22 }
 0x1aa   : > { %s1050_s13 = scalar_lea.vmem %s899_s22, 256  ;;  %p1057_p0 = scmp.lt.s32.totalorder %s899_s22, %s1055_s28 }
 0x1ab   : > { %p1051_p11 = scmp.ne.s32.totalorder %s899_s22, %s1050_s13  ;;  %p1058_p1 = scmp.lt.s32.totalorder %s1056_s15, %s1050_s13 }
 0x1ac   : > { %661 = vrot.lane.b32.xlu0 %v656_v36, %s1129_s23  ;;  %657 = vrot.lane.b32.xlu1 %v655_v37, %s1129_s23 }
 0x1ad   : > { %p1052_p12 = pnand %p1051_p11, %p1209_p5  ;;  %p1059_p2 = por %p1058_p1, %p1057_p0 }
 0x1af   : > { %p1053_p13 = pneg %p1052_p12 }
 0x1b0   : > { %708 = vperm.xlu0 %1037, %v705_v38   ;;  %797 = vperm.xlu1 %1038, %v794_v20  }
 0x1b1   : > { %p1060_p3 = pnand %p1059_p2, %p1053_p13 }
 0x1fa   : > { %v643_v43 = vpop.permute.xlu0 %642  ;;  %v617_v44 = vpop.permute.xlu1 %616 }
 0x1fe   : > { %v630_v45 = vpop.permute.xlu0 %629  ;;  %v688_v46 = vpop.permute.xlu1 %687 }
 0x1ff   : > { %v693_v13 = vsel %vm691_vm7, %v688_v46, %v690_v41  ;;  %v704_v41 = vld [vmem:[%s1422_s3] sm:$0xf] }
 0x202   : > { %v602_v47 = vpop.permute.xlu0 %601  ;;  %v585_v48 = vpop.permute.xlu1 %584 }
 0x206   : > { %v598_v49 = vpop.permute.xlu0 %597  ;;  %v572_v50 = vpop.permute.xlu1 %571 }
 0x20a   : > { %v589_v51 = vpop.permute.xlu0 %588  ;;  %v1327_v52 = vpop.permute.xlu1 %659 }
 0x20e   : > { %v568_v53 = vpop.permute.xlu0 %567  ;;  %v645_v54 = vpop.permute.xlu1 %644 }
 0x20f   : > { %v649_v55 = vsel %vm648_vm14, %v643_v43, %v645_v54  ;;  %v650_v56 = vsel %vm648_vm14, %v645_v54, %v647_v39 }
 0x210   : > { %v654_v57 = vsel %vm555_vm15, %v650_v56, 0.0  ;;  %v653_v58 = vsel %vm554_vm0, %v649_v55, 0.0 }
 0x211   : > { %967 = vmatprep.subr.msk.mxu1 %vm450_vm3, %v654_v57 }
 0x212   : > { %v619_v59 = vpop.permute.xlu0 %618  ;;  %968 = vmatpush1.msk.msra.mxu1 %vm450_vm3, %v653_v58  ;;  %v600_v60 = vpop.permute.xlu1 %599 }
 0x213   : > { %v623_v61 = vsel %vm622_vm1, %v617_v44, %v619_v59  ;;  %v624_v62 = vsel %vm622_vm1, %v619_v59, %v621_v40  ;;  %v604_v63 = vsel %vm603_vm2, %v598_v49, %v600_v60  ;;  %v605_v2 = vsel %vm603_vm2, %v600_v60, %v602_v47 }
 0x214   : > { %v627_v1 = vsel %vm554_vm0, %v623_v61, 0.0  ;;  %v628_v3 = vsel %vm555_vm15, %v624_v62, 0.0  ;;  %v608_v5 = vsel %vm556_vm4, %v604_v63, 0.0  ;;  %v609_v6 = vsel %vm557_vm5, %v605_v2, 0.0 }
 0x215   : > { %v679_v4 = vrot.slane %v627_v1, 4  ;;  %v680_v9 = vrot.slane %v628_v3, 4  ;;  %v670_v18 = vrot.slane %v608_v5, 4  ;;  %v671_v19 = vrot.slane %v609_v6, 4 }
 0x216   : > { %v632_v7 = vpop.permute.xlu0 %631  ;;  %v686_v8 = vpop.permute.xlu1 %685 }
 0x217   : > { %v636_v10 = vsel %vm635_vm6, %v630_v45, %v632_v7  ;;  %v637_v11 = vsel %vm635_vm6, %v632_v7, %v634_v42  ;;  %v692_v12 = vsel %vm691_vm7, %v686_v8, %v688_v46  ;;  %v701_v26 = vsel %vm450_vm3, %v1315_v33, %v680_v9 }
 0x218   : > { %v640_v14 = vsel %vm556_vm4, %v636_v10, 0.0  ;;  %v641_v15 = vsel %vm557_vm5, %v637_v11, 0.0  ;;  %v700_v27 = vsel %vm450_vm3, %v1304_v30, %v679_v4 }
 0x219   : > { %v703_v16 = vsel %vm450_vm3, %v641_v15, %v693_v13  ;;  %v702_v17 = vsel %vm450_vm3, %v640_v14, %v692_v12 }
 0x21a   : > { %v570_v22 = vpop.permute.xlu0 %569  ;;  %744 = vmatprep.subr.mxu1 %v703_v16  ;;  %v587_v23 = vpop.permute.xlu1 %586 }
 0x21b   : > { %v591_v24 = vsel %vm590_vm8, %v585_v48, %v587_v23  ;;  %v592_v25 = vsel %vm590_vm8, %v587_v23, %v589_v51  ;;  %745 = vmatpush1.msra.mxu1 %v702_v17  ;;  %v574_v28 = vsel %vm573_vm9, %v568_v53, %v570_v22  ;;  %v575_v0 = vsel %vm573_vm9, %v570_v22, %v572_v50  ;;  %v793_v48 = vld [vmem:[%s1424_s5] sm:$0xff] }
 0x21c   : > { %v595_v29 = vsel %vm554_vm0, %v591_v24, 0.0  ;;  %v596_v31 = vsel %vm555_vm15, %v592_v25, 0.0  ;;  %746 = vmatprep.subr.mxu1 %v701_v26  ;;  %v578_v30 = vsel %vm556_vm4, %v574_v28, 0.0  ;;  %v579_v36 = vsel %vm557_vm5, %v575_v0, 0.0 }
 0x21d   : > { %747 = vmatpush1.msra.mxu1 %v700_v27  ;;  %v699_v32 = vsel %vm450_vm3, %v596_v31, %v671_v19  ;;  %v698_v34 = vsel %vm450_vm3, %v595_v29, %v670_v18 }
 0x21e   : > { %v662_v35 = vpop.permute.xlu0 %661  ;;  %748 = vmatprep.subr.mxu1 %v699_v32  ;;  %v658_v33 = vpop.permute.xlu1 %657 }
 0x21f   : > { %v665_v37 = vsel %vm663_vm10, %v1327_v52, %v662_v35  ;;  %v664_v38 = vsel %vm663_vm10, %v658_v33, %v1327_v52  ;;  %749 = vmatpush1.msra.mxu1 %v698_v34 }
 0x220   : > { %v697_v39 = vsel %vm450_vm3, %v579_v36, %v665_v37  ;;  %v696_v40 = vsel %vm450_vm3, %v578_v30, %v664_v38 }
 0x221   : > { %750 = vmatprep.subr.mxu1 %v697_v39 }
 0x222   : > { %751 = vmatpush1.msra.mxu1 %v696_v40 }
 0x223   : > { %969 = vmatmul.mubr.msk.f32.vlgmr.msra.gmra.mxu1 %vm466_vm13, %v704_v41 }
 0x22b   : > { %v709_v42 = vpop.permute.xlu0 %708  ;;  %v798_v49 = vpop.permute.xlu1 %797 }
 0x2e3   : > { %v786_v21 = vpop.f32.mrf.mxu1 }
 0x2e4   : > { %v787_v43 = vadd.f32 %v786_v21, %v709_v42 }
 0x2e5   : > { %v788_v44 = vpop.f32.mrf.mxu1 }
 0x2e6   : > { %v789_v45 = vadd.f32 %v788_v44, %v709_v42  ;;  %v791_v47 = vmax.f32 %v787_v43, 0.0 }
 0x2e8   : > { %v792_v46 = vmax.f32 %v789_v45, 0.0 }
 0x2ea   : > { %970 = vmatprep.subr.msk.mxu0 %vm450_vm3, %v792_v46 }
 0x2eb   : > { %971 = vmatpush1.msk.msra.mxu0 %vm450_vm3, %v791_v47 }
 0x2ec   : > { %972 = vmatmul.mubr.msk.f32.vlgmr.msra.gmra.mxu0 %vm800_vm11, %v793_v48 }
 0x3ac   : > { %v876_v50 = vpop.f32.mrf.mxu0 }
 0x3ad   : > { %v877_v51 = vadd.f32 %v876_v50, %v798_v49 }
 0x3ae   : > { %v878_v52 = vpop.f32.mrf.mxu0 }
 0x3af   : > { %v879_v53 = vadd.f32 %v878_v52, %v798_v49  ;;  %881 = vst [vmem:[%s271_s21] sm:$0xff] %v877_v51 }
 0x3b1   : > { %882 = vst [vmem:[%s271_s21 + $0x8] sm:$0xff] %v879_v53 }
 0x3b2   : > { %1063 = shalt.err (!%p1060_p3)
}
 0x3b3   : > { %s1064_s16 = scalar_lea.hbm %s896_s8, 256  ;;  %s1068_s19 = scalar_lea.hbm %s1426_s7, 512 }
 0x3b4   : > { %p1065_p4 = scmp.ne.s32.totalorder %s896_s8, %s1064_s16  ;;  %p1069_p9 = scmp.lt.s32.totalorder %s896_s8, %s1426_s7 }
 0x3b5   : > { %p1070_p10 = scmp.lt.s32.totalorder %s1068_s19, %s1064_s16 }
 0x3b6   : > { %p1066_p7 = pnand %p1065_p4, %p1209_p5 }
 0x3b7   : > { %p1071_p11 = por %p1070_p10, %p1069_p9 }
 0x3b8   : > { %p1067_p8 = pneg %p1066_p7 }
 0x3ba   : > { %p1072_p12 = pnand %p1071_p11, %p1067_p8 }
 0x3bc   : > { %1075 = shalt.err (!%p1072_p12)
}
 0x3bd   : > { %980 = dma.vmem_to_hbm [thread:$0]  (%p1209_p5), %s899_s22, 256, %s896_s8, %s884_s9  }
 0x3be PF: > { %p986_p13 = scmp.ge.s32.totalorder %s1110_s27, 2  ;;  %s910_s23 = sand.u32 1, %s1098_s24  }
 0x3bf   : > { %s911_s29 = scalar_lea.sflag [#allocation4], %s910_s23 }
 0x3c0   : > { %p983_p0 = pnand %p986_p13, %p1213_p6 }
 0x3c2   : > { %p984_p1 = pneg %p983_p0 }
 0x3c4   : > { %1093 = dma.done.wait (%p984_p1), %s911_s29, 256  }
 0x3c5   : > { %1095 = vsyncadd (%p984_p1), %s911_s29, 4294967040  ;;  %p17_p2 = scmp.ge.s32.totalorder %s1196_s30, 4   ;;  %s1429_s24 = smov %s1102_s25 }
 0x3c6   : > { %s1430_s25 = smov %s1106_s26  ;;  %s1431_s26 = smov %s1207_s10 }
 0x3c7   : > { %s1432_s27 = smov %s1196_s30  ;;  %19 = sbr.rel (!%p17_p2) target bundleno = 3 (0x3), region = 83 }
 0x3cc   :  { %916 = vsyncpa [#allocation4], 1 }
 0x3cd   :  { %918 = vsyncpa [#allocation4 + $0x1], 1 }

</bundles_post_ra>
